<compile_context>
chip_gen: v6e
topology: v6e:2x2x1
jax: 0.10.0
libtpu: 0.0.40
codegen_flags: <defaults>
</compile_context>

<pallas_src>
import numpy as np
import jax
import jax.numpy as jnp
from jax.experimental import pallas as pl
from jax.experimental.pallas import tpu as pltpu

_LANE = 128


# ---------------------------- fused Pallas kernel ----------------------------

def _dpcnn_kernel(x_ref, w1_ref, w2_ref, wfc_ref, o_ref, pool_ref):
    f32, bf16 = jnp.float32, jnp.bfloat16
    bsz, seq, _ = x_ref.shape
    nf = w2_ref.shape[1]                       # num_filters
    l0 = seq - 2                               # height after conv_region (valid conv)

    w2 = w2_ref[...]                           # (3F+1, F) bf16, reused by all 6 convs

    def ones_col(n, dt):
        return jnp.ones((n, 1), dt)

    # ---------------- conv_region: valid 3-tap conv over the encoder rows ----------------
    # Per batch item, row i of the fused-K input is [e[i], e[i+1], e[i+2], 1]  (K = 3H+1);
    # batch items are stacked into M so the whole layer is a single matmul.
    pieces = []
    for b in range(bsz):                                            # tiny static batch
        e = x_ref[b]                                                 # (S, H) f32
        pieces.append(jnp.concatenate(
            [e[0:l0], e[1:l0 + 1], e[2:l0 + 2], ones_col(l0, f32)], axis=-1))
    x = jnp.dot(jnp.concatenate(pieces, axis=0).astype(bf16), w1_ref[...],
                preferred_element_type=f32)                          # (B*l0, F) f32

    # --------- per-level helpers (batch stacked along rows: stacked row = b*l + i) ---------
    def masks(l):
        i = jax.lax.broadcasted_iota(jnp.int32, (bsz * l, nf), 0) % l
        return i == 0, i == l - 1, i >= l - 2     # block-first row, block-last, last two

    def shift_down(v):        # out[i] = v[i-1]    (caller zeroes block-first rows)
        return jnp.concatenate([jnp.zeros((1, nf), v.dtype), v[:-1]], axis=0)

    def shift_up(v, k):       # out[i] = v[i+k]    (caller zeroes the last k rows per block)
        return jnp.concatenate([v[k:], jnp.zeros((k, nf), v.dtype)], axis=0)

    def relu_conv(v, m_first, m_last):
        # padding1 + ReLU + Conv2d(F, F, (3,1)) as ONE fused-K bf16 MXU matmul; the conv
        # bias is folded into the last K channel via the constant 1.0 column.
        r = jnp.maximum(v, 0.0)
        prev = jnp.where(m_first, 0.0, shift_down(r))
        nxt = jnp.where(m_last, 0.0, shift_up(r, 1))
        k3 = jnp.concatenate([prev, r, nxt, ones_col(r.shape[0], f32)],
                             axis=-1).astype(bf16)                   # (B*l, 3F+1)
        return jnp.dot(k3, w2, preferred_element_type=f32)           # (B*l, F) f32

    def pool(v, l, lo, m_last, m_last2):
        # padding2 + MaxPool2d((3,1), stride=2): block-wide 3-row max over shifted copies,
        # then one strided row selection of the window-start rows.
        m = jnp.maximum(jnp.maximum(v, jnp.where(m_last, 0.0, shift_up(v, 1))),
                        jnp.where(m_last2, 0.0, shift_up(v, 2)))
        if 2 * lo == l:
            # per-batch stride-2 window starts tile into one global stride-2 pattern
            pool_ref[0:bsz * l, :] = m
            return pool_ref[pl.ds(0, bsz * lo, stride=2), :]
        # odd heights (e.g. the final 3 -> 1 pool): tiny static gather of the start rows
        return jnp.concatenate([m[b * l + 2 * j: b * l + 2 * j + 1]
                                for b in range(bsz) for j in range(lo)], axis=0)

    # -------------------------------- DPCNN pyramid --------------------------------
    l = l0
    m_first, m_last, m_last2 = masks(l)
    x = relu_conv(x, m_first, m_last)
    x = relu_conv(x, m_first, m_last)
    while l > 2:                               # static shapes -> plain Python loop
        lo = (l - 2) // 2 + 1
        px = pool(x, l, lo, m_last, m_last2)
        l = lo
        m_first, m_last, m_last2 = masks(l)
        x = relu_conv(px, m_first, m_last)
        x = relu_conv(x, m_first, m_last)
        x = x + px
    # PyTorch does .squeeze(); keep the batch dim and require the pyramid to end at height 1.
    assert l == 1, f"pyramid ended at height {l}, expected 1"

    # ------------------------------------ fc ------------------------------------
    xf = jnp.concatenate([x, ones_col(bsz, f32)], axis=-1).astype(bf16)   # (B, F+1)
    o_ref[...] = jnp.dot(xf, wfc_ref[...], preferred_element_type=f32)    # (B, Cp) lane-dense


# ---------------------------- parameter prep (one-time) ----------------------------

def _round_up(n, m):
    return ((n + m - 1) // m) * m


def prepare_params(w1, b1, w2, b2, wfc, bfc):
    """PyTorch-layout -> fused-K bf16 matmul-layout conversion (one-time, outside the fwd).

    Returns:
      w1m: (3H+1, F)  conv_region weight, 3 taps stacked along K, bias folded in the last row.
      w2m: (3F+1, F)  conv weight, 3 taps stacked along K, bias folded in the last row.
      wfcm: (F+1, Cp) fc weight, bias folded, classes zero-padded to a lane-dense 128.
    """
    f = w1.shape[0]
    h = w1.shape[3]
    c = wfc.shape[0]
    cp = _round_up(c, _LANE)
    bf16 = jnp.bfloat16
    # conv_region.weight (F, 1, 3, H): row k*H + h of w1m is w1[:, 0, k, h]
    w1m = jnp.transpose(w1[:, 0, :, :], (1, 2, 0)).reshape(3 * h, f)
    w1m = jnp.concatenate([w1m, b1.reshape(1, f)], axis=0)
    # conv.weight (F, F, 3, 1): row k*F + fi of w2m is w2[:, fi, k, 0]
    w2m = jnp.transpose(w2[:, :, :, 0], (2, 1, 0)).reshape(3 * f, f)
    w2m = jnp.concatenate([w2m, b2.reshape(1, f)], axis=0)
    # fc.weight (C, F), fc.bias (C,)
    wfcm = jnp.concatenate([wfc.T, bfc.reshape(1, c)], axis=0)
    wfcm = jnp.pad(wfcm, ((0, 0), (0, cp - c)))
    return w1m.astype(bf16), w2m.astype(bf16), wfcm.astype(bf16)


# ---------------------------- forward wrapper ----------------------------

def dpcnn_forward(encoder_out, params, num_classes):
    """encoder_out: (B, S, H) float32; params from prepare_params()."""
    w1m, w2m, wfcm = params
    bsz, s, h = encoder_out.shape
    nf = w2m.shape[1]
    cp = wfcm.shape[1]
    lmax = s - 2
    out = pl.pallas_call(
        _dpcnn_kernel,
        out_shape=jax.ShapeDtypeStruct((bsz, cp), jnp.float32),
        grid_spec=pltpu.PrefetchScalarGridSpec(
            num_scalar_prefetch=0,
            grid=(1,),
            in_specs=[
                pl.BlockSpec((bsz, s, h), lambda i: (0, 0, 0)),
                pl.BlockSpec(w1m.shape, lambda i: (0, 0)),
                pl.BlockSpec(w2m.shape, lambda i: (0, 0)),
                pl.BlockSpec(wfcm.shape, lambda i: (0, 0)),
            ],
            out_specs=pl.BlockSpec((bsz, cp), lambda i: (0, 0)),
            scratch_shapes=[pltpu.VMEM((bsz * lmax, nf), jnp.float32)],
        ),
        compiler_params=pltpu.CompilerParams(dimension_semantics=("arbitrary",)),
    )(encoder_out, w1m, w2m, wfcm)
    return out[:, :num_classes]


# ---------------------------- NumPy reference (PyTorch NCHW semantics) ----------------------------

def _np_conv2d(x, w, b):
    B, ci, hh, wd = x.shape
    co, _, kh, kw = w.shape
    ho, wo = hh - kh + 1, wd - kw + 1
    out = np.zeros((B, co, ho, wo), np.float32)
    for bi in range(B):
        for f in range(co):
            for i in range(ho):
                for j in range(wo):
                    out[bi, f, i, j] = np.sum(x[bi, :, i:i + kh, j:j + kw] * w[f]) + b[f]
    return out


def _np_pad_h(x, top, bottom):
    return np.pad(x, ((0, 0), (0, 0), (top, bottom), (0, 0)))


def _np_maxpool(x):
    B, c, hh, wd = x.shape
    ho = (hh - 3) // 2 + 1
    out = np.zeros((B, c, ho, wd), np.float32)
    for i in range(ho):
        out[:, :, i, :] = x[:, :, 2 * i:2 * i + 3, :].max(axis=2)
    return out


def reference_forward(enc, w1, b1, w2, b2, wfc, bfc):
    x = enc[:, None, :, :]
    x = _np_conv2d(x, w1, b1)
    x = _np_pad_h(x, 1, 1); x = np.maximum(x, 0); x = _np_conv2d(x, w2, b2)
    x = _np_pad_h(x, 1, 1); x = np.maximum(x, 0); x = _np_conv2d(x, w2, b2)
    while x.shape[2] > 2:
        xp = _np_pad_h(x, 0, 1)
        px = _np_maxpool(xp)
        x = _np_pad_h(px, 1, 1); x = np.maximum(x, 0); x = _np_conv2d(x, w2, b2)
        x = _np_pad_h(x, 1, 1); x = np.maximum(x, 0); x = _np_conv2d(x, w2, b2)
        x = x + px
    x = np.squeeze(x)
    return x @ wfc.T + bfc


# ---------------------------- main ----------------------------

if __name__ == "__main__":
    B, S, H, F, C, V = 2, 8, 32, 32, 4, 64   # batch, seq, hidden, num_filters, num_classes, vocab
    key = jax.random.PRNGKey(0)
    k_emb, k_w1, k_b1, k_w2, k_b2, k_wfc, k_bfc, k_ctx = jax.random.split(key, 8)

    def bf16_round(a):
        # Quantize once so the kernel (bf16 MXU path) and the f32 reference see identical inputs.
        return a.astype(jnp.bfloat16).astype(jnp.float32)

    # Synthetic deterministic "BERT" encoder output (see TODO at top of file).
    emb = jax.random.normal(k_emb, (V, H), jnp.float32) * 0.5
    context = jax.random.randint(k_ctx, (B, S), 0, V)
    mask = jnp.ones((B, S), jnp.float32).at[:, -1].set(0.0)
    encoder_out = bf16_round(emb[context] * mask[..., None])            # (B, S, H)

    # Deterministic parameters in their PyTorch shapes (pre-rounded to bf16 values).
    w1 = bf16_round(jax.random.normal(k_w1, (F, 1, 3, H), jnp.float32) * 0.1)   # conv_region.weight
    b1 = bf16_round(jax.random.normal(k_b1, (F,), jnp.float32) * 0.1)           # conv_region.bias
    w2 = bf16_round(jax.random.normal(k_w2, (F, F, 3, 1), jnp.float32) * 0.1)   # conv.weight
    b2 = bf16_round(jax.random.normal(k_b2, (F,), jnp.float32) * 0.1)           # conv.bias
    wfc = bf16_round(jax.random.normal(k_wfc, (C, F), jnp.float32) * 0.1)       # fc.weight
    bfc = bf16_round(jax.random.normal(k_bfc, (C,), jnp.float32) * 0.1)         # fc.bias

    params = prepare_params(w1, b1, w2, b2, wfc, bfc)                   # one-time layout prep
    logits = dpcnn_forward(encoder_out, params, C)
    logits = jax.block_until_ready(logits)

    ref = reference_forward(np.asarray(encoder_out), np.asarray(w1), np.asarray(b1),
                            np.asarray(w2), np.asarray(b2), np.asarray(wfc), np.asarray(bfc))
    assert logits.shape == (B, C), f"bad output shape {logits.shape}"
    # bf16 MXU inputs / f32 accumulation vs. a pure-f32 reference: relaxed tolerance.
    assert np.allclose(np.asarray(logits), ref, rtol=5e-2, atol=5e-2), "mismatch vs reference"
    print("KERNEL_OK")
</pallas_src>

<mosaic_0001>
module attributes {stable_mosaic.version = 11 : i64} {
  func.func @_dpcnn_kernel(%arg0: i32, %arg1: memref<2x8x32xf32, #tpu.memory_space<vmem>>, %arg2: memref<97x32xbf16, #tpu.memory_space<vmem>>, %arg3: memref<97x32xbf16, #tpu.memory_space<vmem>>, %arg4: memref<33x128xbf16, #tpu.memory_space<vmem>>, %arg5: memref<2x128xf32, #tpu.memory_space<vmem>>, %arg6: memref<12x32xf32, #tpu.memory_space<vmem>>) attributes {dimension_semantics = [#tpu.dimension_semantics<arbitrary>], iteration_bounds = array<i64: 1>, scalar_prefetch = 0 : i64, scratch_operands = 1 : i64, tpu.core_type = #tpu.core_type<tc>, window_params = [{pipeline_mode = #tpu.pipeline_mode<synchronous>, transform_indices = @transform_0, window_bounds = array<i64: 2, 8, 32>}, {pipeline_mode = #tpu.pipeline_mode<synchronous>, transform_indices = @transform_1, window_bounds = array<i64: 97, 32>}, {pipeline_mode = #tpu.pipeline_mode<synchronous>, transform_indices = @transform_2, window_bounds = array<i64: 97, 32>}, {pipeline_mode = #tpu.pipeline_mode<synchronous>, transform_indices = @transform_3, window_bounds = array<i64: 33, 128>}, {pipeline_mode = #tpu.pipeline_mode<synchronous>, transform_indices = @transform_4, window_bounds = array<i64: 2, 128>}]} {
    %c0 = arith.constant 0 : index
    %c0_0 = arith.constant 0 : index
    %0 = vector.load %arg3[%c0, %c0_0] : memref<97x32xbf16, #tpu.memory_space<vmem>>, vector<97x32xbf16>
    %c0_1 = arith.constant 0 : index
    %c0_2 = arith.constant 0 : index
    %c0_3 = arith.constant 0 : index
    %1 = vector.load %arg1[%c0_1, %c0_2, %c0_3] : memref<2x8x32xf32, #tpu.memory_space<vmem>>, vector<1x8x32xf32>
    %2 = vector.shape_cast %1 : vector<1x8x32xf32> to vector<8x32xf32>
    %3 = vector.extract_strided_slice %2 {offsets = [0, 0], sizes = [6, 32], strides = [1, 1]} : vector<8x32xf32> to vector<6x32xf32>
    %4 = vector.extract_strided_slice %2 {offsets = [1, 0], sizes = [6, 32], strides = [1, 1]} : vector<8x32xf32> to vector<6x32xf32>
    %5 = vector.extract_strided_slice %2 {offsets = [2, 0], sizes = [6, 32], strides = [1, 1]} : vector<8x32xf32> to vector<6x32xf32>
    %cst = arith.constant 1.000000e+00 : f32
    %6 = vector.broadcast %cst : f32 to vector<6x1xf32>
    %7 = tpu.concatenate %3, %4, %5, %6 in 1 : vector<6x32xf32>, vector<6x32xf32>, vector<6x32xf32>, vector<6x1xf32> -> vector<6x97xf32>
    %c1 = arith.constant 1 : index
    %c0_4 = arith.constant 0 : index
    %c0_5 = arith.constant 0 : index
    %8 = vector.load %arg1[%c1, %c0_4, %c0_5] : memref<2x8x32xf32, #tpu.memory_space<vmem>>, vector<1x8x32xf32>
    %9 = vector.shape_cast %8 : vector<1x8x32xf32> to vector<8x32xf32>
    %10 = vector.extract_strided_slice %9 {offsets = [0, 0], sizes = [6, 32], strides = [1, 1]} : vector<8x32xf32> to vector<6x32xf32>
    %11 = vector.extract_strided_slice %9 {offsets = [1, 0], sizes = [6, 32], strides = [1, 1]} : vector<8x32xf32> to vector<6x32xf32>
    %12 = vector.extract_strided_slice %9 {offsets = [2, 0], sizes = [6, 32], strides = [1, 1]} : vector<8x32xf32> to vector<6x32xf32>
    %cst_6 = arith.constant 1.000000e+00 : f32
    %13 = vector.broadcast %cst_6 : f32 to vector<6x1xf32>
    %14 = tpu.concatenate %10, %11, %12, %13 in 1 : vector<6x32xf32>, vector<6x32xf32>, vector<6x32xf32>, vector<6x1xf32> -> vector<6x97xf32>
    %15 = tpu.concatenate %7, %14 in 0 : vector<6x97xf32>, vector<6x97xf32> -> vector<12x97xf32>
    %16 = arith.truncf %15 : vector<12x97xf32> to vector<12x97xbf16>
    %c0_7 = arith.constant 0 : index
    %c0_8 = arith.constant 0 : index
    %17 = vector.load %arg2[%c0_7, %c0_8] : memref<97x32xbf16, #tpu.memory_space<vmem>>, vector<97x32xbf16>
    %cst_9 = arith.constant dense<0.000000e+00> : vector<12x32xf32>
    %18 = tpu.matmul %16, %17, %cst_9 {dimension_numbers = #tpu.dot_dimension_numbers<[1], [0], [0], [1], [0, 0, 1, 1], [], []>} : vector<12x97xbf16>, vector<97x32xbf16>, vector<12x32xf32> -> vector<12x32xf32>
    %19 = tpu.iota {dimensions = array<i32: 0>} : vector<12x32xi32>
    %c6_i32 = arith.constant 6 : i32
    %c0_i32 = arith.constant 0 : i32
    %20 = arith.cmpi eq, %c6_i32, %c0_i32 : i32
    %c1_i32 = arith.constant 1 : i32
    %21 = arith.select %20, %c1_i32, %c6_i32 : i32
    %22 = vector.broadcast %21 : i32 to vector<12x32xi32>
    %23 = arith.remsi %19, %22 : vector<12x32xi32>
    %c0_i32_10 = arith.constant 0 : i32
    %24 = vector.broadcast %c0_i32_10 : i32 to vector<12x32xi32>
    %25 = arith.cmpi ne, %23, %24 : vector<12x32xi32>
    %c0_i32_11 = arith.constant 0 : i32
    %26 = vector.broadcast %c0_i32_11 : i32 to vector<12x32xi32>
    %27 = arith.cmpi slt, %23, %26 : vector<12x32xi32>
    %c0_i32_12 = arith.constant 0 : i32
    %28 = arith.cmpi slt, %21, %c0_i32_12 : i32
    %29 = vector.broadcast %28 : i1 to vector<12x32xi1>
    %30 = vector.broadcast %29 : vector<12x32xi1> to vector<12x32xi1>
    %31 = arith.xori %27, %30 : vector<12x32xi1>
    %32 = arith.andi %31, %25 : vector<12x32xi1>
    %33 = vector.broadcast %21 : i32 to vector<12x32xi32>
    %34 = arith.addi %23, %33 : vector<12x32xi32>
    %35 = arith.select %32, %34, %23 : vector<12x32xi1>, vector<12x32xi32>
    %c0_i32_13 = arith.constant 0 : i32
    %36 = vector.broadcast %c0_i32_13 : i32 to vector<12x32xi32>
    %37 = arith.cmpi eq, %35, %36 : vector<12x32xi32>
    %c5_i32 = arith.constant 5 : i32
    %38 = vector.broadcast %c5_i32 : i32 to vector<12x32xi32>
    %39 = arith.cmpi eq, %35, %38 : vector<12x32xi32>
    %c4_i32 = arith.constant 4 : i32
    %40 = vector.broadcast %c4_i32 : i32 to vector<12x32xi32>
    %41 = arith.cmpi sge, %35, %40 : vector<12x32xi32>
    %cst_14 = arith.constant 0.000000e+00 : f32
    %42 = vector.broadcast %cst_14 : f32 to vector<12x32xf32>
    %43 = arith.maximumf %18, %42 : vector<12x32xf32>
    %cst_15 = arith.constant 0.000000e+00 : f32
    %44 = vector.broadcast %cst_15 : f32 to vector<1x32xf32>
    %45 = vector.extract_strided_slice %43 {offsets = [0, 0], sizes = [11, 32], strides = [1, 1]} : vector<12x32xf32> to vector<11x32xf32>
    %46 = tpu.concatenate %44, %45 in 0 : vector<1x32xf32>, vector<11x32xf32> -> vector<12x32xf32>
    %cst_16 = arith.constant 0.000000e+00 : f32
    %47 = vector.broadcast %cst_16 : f32 to vector<12x32xf32>
    %48 = arith.select %37, %47, %46 : vector<12x32xi1>, vector<12x32xf32>
    %49 = vector.extract_strided_slice %43 {offsets = [1, 0], sizes = [11, 32], strides = [1, 1]} : vector<12x32xf32> to vector<11x32xf32>
    %cst_17 = arith.constant 0.000000e+00 : f32
    %50 = vector.broadcast %cst_17 : f32 to vector<1x32xf32>
    %51 = tpu.concatenate %49, %50 in 0 : vector<11x32xf32>, vector<1x32xf32> -> vector<12x32xf32>
    %cst_18 = arith.constant 0.000000e+00 : f32
    %52 = vector.broadcast %cst_18 : f32 to vector<12x32xf32>
    %53 = arith.select %39, %52, %51 : vector<12x32xi1>, vector<12x32xf32>
    %cst_19 = arith.constant 1.000000e+00 : f32
    %54 = vector.broadcast %cst_19 : f32 to vector<12x1xf32>
    %55 = tpu.concatenate %48, %43, %53, %54 in 1 : vector<12x32xf32>, vector<12x32xf32>, vector<12x32xf32>, vector<12x1xf32> -> vector<12x97xf32>
    %56 = arith.truncf %55 : vector<12x97xf32> to vector<12x97xbf16>
    %cst_20 = arith.constant dense<0.000000e+00> : vector<12x32xf32>
    %57 = tpu.matmul %56, %0, %cst_20 {dimension_numbers = #tpu.dot_dimension_numbers<[1], [0], [0], [1], [0, 0, 1, 1], [], []>} : vector<12x97xbf16>, vector<97x32xbf16>, vector<12x32xf32> -> vector<12x32xf32>
    %cst_21 = arith.constant 0.000000e+00 : f32
    %58 = vector.broadcast %cst_21 : f32 to vector<12x32xf32>
    %59 = arith.maximumf %57, %58 : vector<12x32xf32>
    %cst_22 = arith.constant 0.000000e+00 : f32
    %60 = vector.broadcast %cst_22 : f32 to vector<1x32xf32>
    %61 = vector.extract_strided_slice %59 {offsets = [0, 0], sizes = [11, 32], strides = [1, 1]} : vector<12x32xf32> to vector<11x32xf32>
    %62 = tpu.concatenate %60, %61 in 0 : vector<1x32xf32>, vector<11x32xf32> -> vector<12x32xf32>
    %cst_23 = arith.constant 0.000000e+00 : f32
    %63 = vector.broadcast %cst_23 : f32 to vector<12x32xf32>
    %64 = arith.select %37, %63, %62 : vector<12x32xi1>, vector<12x32xf32>
    %65 = vector.extract_strided_slice %59 {offsets = [1, 0], sizes = [11, 32], strides = [1, 1]} : vector<12x32xf32> to vector<11x32xf32>
    %cst_24 = arith.constant 0.000000e+00 : f32
    %66 = vector.broadcast %cst_24 : f32 to vector<1x32xf32>
    %67 = tpu.concatenate %65, %66 in 0 : vector<11x32xf32>, vector<1x32xf32> -> vector<12x32xf32>
    %cst_25 = arith.constant 0.000000e+00 : f32
    %68 = vector.broadcast %cst_25 : f32 to vector<12x32xf32>
    %69 = arith.select %39, %68, %67 : vector<12x32xi1>, vector<12x32xf32>
    %cst_26 = arith.constant 1.000000e+00 : f32
    %70 = vector.broadcast %cst_26 : f32 to vector<12x1xf32>
    %71 = tpu.concatenate %64, %59, %69, %70 in 1 : vector<12x32xf32>, vector<12x32xf32>, vector<12x32xf32>, vector<12x1xf32> -> vector<12x97xf32>
    %72 = arith.truncf %71 : vector<12x97xf32> to vector<12x97xbf16>
    %cst_27 = arith.constant dense<0.000000e+00> : vector<12x32xf32>
    %73 = tpu.matmul %72, %0, %cst_27 {dimension_numbers = #tpu.dot_dimension_numbers<[1], [0], [0], [1], [0, 0, 1, 1], [], []>} : vector<12x97xbf16>, vector<97x32xbf16>, vector<12x32xf32> -> vector<12x32xf32>
    %74 = vector.extract_strided_slice %73 {offsets = [1, 0], sizes = [11, 32], strides = [1, 1]} : vector<12x32xf32> to vector<11x32xf32>
    %cst_28 = arith.constant 0.000000e+00 : f32
    %75 = vector.broadcast %cst_28 : f32 to vector<1x32xf32>
    %76 = tpu.concatenate %74, %75 in 0 : vector<11x32xf32>, vector<1x32xf32> -> vector<12x32xf32>
    %cst_29 = arith.constant 0.000000e+00 : f32
    %77 = vector.broadcast %cst_29 : f32 to vector<12x32xf32>
    %78 = arith.select %39, %77, %76 : vector<12x32xi1>, vector<12x32xf32>
    %79 = arith.maximumf %73, %78 : vector<12x32xf32>
    %80 = vector.extract_strided_slice %73 {offsets = [2, 0], sizes = [10, 32], strides = [1, 1]} : vector<12x32xf32> to vector<10x32xf32>
    %cst_30 = arith.constant 0.000000e+00 : f32
    %81 = vector.broadcast %cst_30 : f32 to vector<2x32xf32>
    %82 = tpu.concatenate %80, %81 in 0 : vector<10x32xf32>, vector<2x32xf32> -> vector<12x32xf32>
    %cst_31 = arith.constant 0.000000e+00 : f32
    %83 = vector.broadcast %cst_31 : f32 to vector<12x32xf32>
    %84 = arith.select %41, %83, %82 : vector<12x32xi1>, vector<12x32xf32>
    %85 = arith.maximumf %79, %84 : vector<12x32xf32>
    %c0_32 = arith.constant 0 : index
    %c0_33 = arith.constant 0 : index
    %86 = vector.load %arg6[%c0_32, %c0_33] : memref<12x32xf32, #tpu.memory_space<vmem>>, vector<12x32xf32>
    tpu.vector_store %arg6[%c0_32, %c0_33], %85 {strides = array<i32>} : memref<12x32xf32, #tpu.memory_space<vmem>>, vector<12x32xf32>,
    %c0_34 = arith.constant 0 : index
    %c0_35 = arith.constant 0 : index
    %87 = tpu.strided_load %arg6[%c0_34, %c0_35] {strides = array<i32: 2, 1>} : memref<12x32xf32, #tpu.memory_space<vmem>>, vector<6x32xf32>
    %88 = tpu.iota {dimensions = array<i32: 0>} : vector<6x32xi32>
    %c3_i32 = arith.constant 3 : i32
    %c0_i32_36 = arith.constant 0 : i32
    %89 = arith.cmpi eq, %c3_i32, %c0_i32_36 : i32
    %c1_i32_37 = arith.constant 1 : i32
    %90 = arith.select %89, %c1_i32_37, %c3_i32 : i32
    %91 = vector.broadcast %90 : i32 to vector<6x32xi32>
    %92 = arith.remsi %88, %91 : vector<6x32xi32>
    %c0_i32_38 = arith.constant 0 : i32
    %93 = vector.broadcast %c0_i32_38 : i32 to vector<6x32xi32>
    %94 = arith.cmpi ne, %92, %93 : vector<6x32xi32>
    %c0_i32_39 = arith.constant 0 : i32
    %95 = vector.broadcast %c0_i32_39 : i32 to vector<6x32xi32>
    %96 = arith.cmpi slt, %92, %95 : vector<6x32xi32>
    %c0_i32_40 = arith.constant 0 : i32
    %97 = arith.cmpi slt, %90, %c0_i32_40 : i32
    %98 = vector.broadcast %97 : i1 to vector<6x32xi1>
    %99 = vector.broadcast %98 : vector<6x32xi1> to vector<6x32xi1>
    %100 = arith.xori %96, %99 : vector<6x32xi1>
    %101 = arith.andi %100, %94 : vector<6x32xi1>
    %102 = vector.broadcast %90 : i32 to vector<6x32xi32>
    %103 = arith.addi %92, %102 : vector<6x32xi32>
    %104 = arith.select %101, %103, %92 : vector<6x32xi1>, vector<6x32xi32>
    %c0_i32_41 = arith.constant 0 : i32
    %105 = vector.broadcast %c0_i32_41 : i32 to vector<6x32xi32>
    %106 = arith.cmpi eq, %104, %105 : vector<6x32xi32>
    %c2_i32 = arith.constant 2 : i32
    %107 = vector.broadcast %c2_i32 : i32 to vector<6x32xi32>
    %108 = arith.cmpi eq, %104, %107 : vector<6x32xi32>
    %c1_i32_42 = arith.constant 1 : i32
    %109 = vector.broadcast %c1_i32_42 : i32 to vector<6x32xi32>
    %110 = arith.cmpi sge, %104, %109 : vector<6x32xi32>
    %cst_43 = arith.constant 0.000000e+00 : f32
    %111 = vector.broadcast %cst_43 : f32 to vector<6x32xf32>
    %112 = arith.maximumf %87, %111 : vector<6x32xf32>
    %cst_44 = arith.constant 0.000000e+00 : f32
    %113 = vector.broadcast %cst_44 : f32 to vector<1x32xf32>
    %114 = vector.extract_strided_slice %112 {offsets = [0, 0], sizes = [5, 32], strides = [1, 1]} : vector<6x32xf32> to vector<5x32xf32>
    %115 = tpu.concatenate %113, %114 in 0 : vector<1x32xf32>, vector<5x32xf32> -> vector<6x32xf32>
    %cst_45 = arith.constant 0.000000e+00 : f32
    %116 = vector.broadcast %cst_45 : f32 to vector<6x32xf32>
    %117 = arith.select %106, %116, %115 : vector<6x32xi1>, vector<6x32xf32>
    %118 = vector.extract_strided_slice %112 {offsets = [1, 0], sizes = [5, 32], strides = [1, 1]} : vector<6x32xf32> to vector<5x32xf32>
    %cst_46 = arith.constant 0.000000e+00 : f32
    %119 = vector.broadcast %cst_46 : f32 to vector<1x32xf32>
    %120 = tpu.concatenate %118, %119 in 0 : vector<5x32xf32>, vector<1x32xf32> -> vector<6x32xf32>
    %cst_47 = arith.constant 0.000000e+00 : f32
    %121 = vector.broadcast %cst_47 : f32 to vector<6x32xf32>
    %122 = arith.select %108, %121, %120 : vector<6x32xi1>, vector<6x32xf32>
    %cst_48 = arith.constant 1.000000e+00 : f32
    %123 = vector.broadcast %cst_48 : f32 to vector<6x1xf32>
    %124 = tpu.concatenate %117, %112, %122, %123 in 1 : vector<6x32xf32>, vector<6x32xf32>, vector<6x32xf32>, vector<6x1xf32> -> vector<6x97xf32>
    %125 = arith.truncf %124 : vector<6x97xf32> to vector<6x97xbf16>
    %cst_49 = arith.constant dense<0.000000e+00> : vector<6x32xf32>
    %126 = tpu.matmul %125, %0, %cst_49 {dimension_numbers = #tpu.dot_dimension_numbers<[1], [0], [0], [1], [0, 0, 1, 1], [], []>} : vector<6x97xbf16>, vector<97x32xbf16>, vector<6x32xf32> -> vector<6x32xf32>
    %cst_50 = arith.constant 0.000000e+00 : f32
    %127 = vector.broadcast %cst_50 : f32 to vector<6x32xf32>
    %128 = arith.maximumf %126, %127 : vector<6x32xf32>
    %cst_51 = arith.constant 0.000000e+00 : f32
    %129 = vector.broadcast %cst_51 : f32 to vector<1x32xf32>
    %130 = vector.extract_strided_slice %128 {offsets = [0, 0], sizes = [5, 32], strides = [1, 1]} : vector<6x32xf32> to vector<5x32xf32>
    %131 = tpu.concatenate %129, %130 in 0 : vector<1x32xf32>, vector<5x32xf32> -> vector<6x32xf32>
    %cst_52 = arith.constant 0.000000e+00 : f32
    %132 = vector.broadcast %cst_52 : f32 to vector<6x32xf32>
    %133 = arith.select %106, %132, %131 : vector<6x32xi1>, vector<6x32xf32>
    %134 = vector.extract_strided_slice %128 {offsets = [1, 0], sizes = [5, 32], strides = [1, 1]} : vector<6x32xf32> to vector<5x32xf32>
    %cst_53 = arith.constant 0.000000e+00 : f32
    %135 = vector.broadcast %cst_53 : f32 to vector<1x32xf32>
    %136 = tpu.concatenate %134, %135 in 0 : vector<5x32xf32>, vector<1x32xf32> -> vector<6x32xf32>
    %cst_54 = arith.constant 0.000000e+00 : f32
    %137 = vector.broadcast %cst_54 : f32 to vector<6x32xf32>
    %138 = arith.select %108, %137, %136 : vector<6x32xi1>, vector<6x32xf32>
    %cst_55 = arith.constant 1.000000e+00 : f32
    %139 = vector.broadcast %cst_55 : f32 to vector<6x1xf32>
    %140 = tpu.concatenate %133, %128, %138, %139 in 1 : vector<6x32xf32>, vector<6x32xf32>, vector<6x32xf32>, vector<6x1xf32> -> vector<6x97xf32>
    %141 = arith.truncf %140 : vector<6x97xf32> to vector<6x97xbf16>
    %cst_56 = arith.constant dense<0.000000e+00> : vector<6x32xf32>
    %142 = tpu.matmul %141, %0, %cst_56 {dimension_numbers = #tpu.dot_dimension_numbers<[1], [0], [0], [1], [0, 0, 1, 1], [], []>} : vector<6x97xbf16>, vector<97x32xbf16>, vector<6x32xf32> -> vector<6x32xf32>
    %143 = arith.addf %142, %87 : vector<6x32xf32>
    %144 = vector.extract_strided_slice %143 {offsets = [1, 0], sizes = [5, 32], strides = [1, 1]} : vector<6x32xf32> to vector<5x32xf32>
    %cst_57 = arith.constant 0.000000e+00 : f32
    %145 = vector.broadcast %cst_57 : f32 to vector<1x32xf32>
    %146 = tpu.concatenate %144, %145 in 0 : vector<5x32xf32>, vector<1x32xf32> -> vector<6x32xf32>
    %cst_58 = arith.constant 0.000000e+00 : f32
    %147 = vector.broadcast %cst_58 : f32 to vector<6x32xf32>
    %148 = arith.select %108, %147, %146 : vector<6x32xi1>, vector<6x32xf32>
    %149 = arith.maximumf %143, %148 : vector<6x32xf32>
    %150 = vector.extract_strided_slice %143 {offsets = [2, 0], sizes = [4, 32], strides = [1, 1]} : vector<6x32xf32> to vector<4x32xf32>
    %cst_59 = arith.constant 0.000000e+00 : f32
    %151 = vector.broadcast %cst_59 : f32 to vector<2x32xf32>
    %152 = tpu.concatenate %150, %151 in 0 : vector<4x32xf32>, vector<2x32xf32> -> vector<6x32xf32>
    %cst_60 = arith.constant 0.000000e+00 : f32
    %153 = vector.broadcast %cst_60 : f32 to vector<6x32xf32>
    %154 = arith.select %110, %153, %152 : vector<6x32xi1>, vector<6x32xf32>
    %155 = arith.maximumf %149, %154 : vector<6x32xf32>
    %156 = vector.extract_strided_slice %155 {offsets = [0, 0], sizes = [1, 32], strides = [1, 1]} : vector<6x32xf32> to vector<1x32xf32>
    %157 = vector.extract_strided_slice %155 {offsets = [3, 0], sizes = [1, 32], strides = [1, 1]} : vector<6x32xf32> to vector<1x32xf32>
    %158 = tpu.concatenate %156, %157 in 0 : vector<1x32xf32>, vector<1x32xf32> -> vector<2x32xf32>
    %159 = tpu.iota {dimensions = array<i32: 0>} : vector<2x32xi32>
    %c1_i32_61 = arith.constant 1 : i32
    %c0_i32_62 = arith.constant 0 : i32
    %160 = arith.cmpi eq, %c1_i32_61, %c0_i32_62 : i32
    %c1_i32_63 = arith.constant 1 : i32
    %161 = arith.select %160, %c1_i32_63, %c1_i32_61 : i32
    %162 = vector.broadcast %161 : i32 to vector<2x32xi32>
    %163 = arith.remsi %159, %162 : vector<2x32xi32>
    %c0_i32_64 = arith.constant 0 : i32
    %164 = vector.broadcast %c0_i32_64 : i32 to vector<2x32xi32>
    %165 = arith.cmpi ne, %163, %164 : vector<2x32xi32>
    %c0_i32_65 = arith.constant 0 : i32
    %166 = vector.broadcast %c0_i32_65 : i32 to vector<2x32xi32>
    %167 = arith.cmpi slt, %163, %166 : vector<2x32xi32>
    %c0_i32_66 = arith.constant 0 : i32
    %168 = arith.cmpi slt, %161, %c0_i32_66 : i32
    %169 = vector.broadcast %168 : i1 to vector<2x32xi1>
    %170 = vector.broadcast %169 : vector<2x32xi1> to vector<2x32xi1>
    %171 = arith.xori %167, %170 : vector<2x32xi1>
    %172 = arith.andi %171, %165 : vector<2x32xi1>
    %173 = vector.broadcast %161 : i32 to vector<2x32xi32>
    %174 = arith.addi %163, %173 : vector<2x32xi32>
    %175 = arith.select %172, %174, %163 : vector<2x32xi1>, vector<2x32xi32>
    %c0_i32_67 = arith.constant 0 : i32
    %176 = vector.broadcast %c0_i32_67 : i32 to vector<2x32xi32>
    %177 = arith.cmpi eq, %175, %176 : vector<2x32xi32>
    %c0_i32_68 = arith.constant 0 : i32
    %178 = vector.broadcast %c0_i32_68 : i32 to vector<2x32xi32>
    %179 = arith.cmpi eq, %175, %178 : vector<2x32xi32>
    %cst_69 = arith.constant 0.000000e+00 : f32
    %180 = vector.broadcast %cst_69 : f32 to vector<2x32xf32>
    %181 = arith.maximumf %158, %180 : vector<2x32xf32>
    %cst_70 = arith.constant 0.000000e+00 : f32
    %182 = vector.broadcast %cst_70 : f32 to vector<1x32xf32>
    %183 = vector.extract_strided_slice %181 {offsets = [0, 0], sizes = [1, 32], strides = [1, 1]} : vector<2x32xf32> to vector<1x32xf32>
    %184 = tpu.concatenate %182, %183 in 0 : vector<1x32xf32>, vector<1x32xf32> -> vector<2x32xf32>
    %cst_71 = arith.constant 0.000000e+00 : f32
    %185 = vector.broadcast %cst_71 : f32 to vector<2x32xf32>
    %186 = arith.select %177, %185, %184 : vector<2x32xi1>, vector<2x32xf32>
    %187 = vector.extract_strided_slice %181 {offsets = [1, 0], sizes = [1, 32], strides = [1, 1]} : vector<2x32xf32> to vector<1x32xf32>
    %cst_72 = arith.constant 0.000000e+00 : f32
    %188 = vector.broadcast %cst_72 : f32 to vector<1x32xf32>
    %189 = tpu.concatenate %187, %188 in 0 : vector<1x32xf32>, vector<1x32xf32> -> vector<2x32xf32>
    %cst_73 = arith.constant 0.000000e+00 : f32
    %190 = vector.broadcast %cst_73 : f32 to vector<2x32xf32>
    %191 = arith.select %179, %190, %189 : vector<2x32xi1>, vector<2x32xf32>
    %cst_74 = arith.constant 1.000000e+00 : f32
    %192 = vector.broadcast %cst_74 : f32 to vector<2x1xf32>
    %193 = tpu.concatenate %186, %181, %191, %192 in 1 : vector<2x32xf32>, vector<2x32xf32>, vector<2x32xf32>, vector<2x1xf32> -> vector<2x97xf32>
    %194 = arith.truncf %193 : vector<2x97xf32> to vector<2x97xbf16>
    %cst_75 = arith.constant dense<0.000000e+00> : vector<2x32xf32>
    %195 = tpu.matmul %194, %0, %cst_75 {dimension_numbers = #tpu.dot_dimension_numbers<[1], [0], [0], [1], [0, 0, 1, 1], [], []>} : vector<2x97xbf16>, vector<97x32xbf16>, vector<2x32xf32> -> vector<2x32xf32>
    %cst_76 = arith.constant 0.000000e+00 : f32
    %196 = vector.broadcast %cst_76 : f32 to vector<2x32xf32>
    %197 = arith.maximumf %195, %196 : vector<2x32xf32>
    %cst_77 = arith.constant 0.000000e+00 : f32
    %198 = vector.broadcast %cst_77 : f32 to vector<1x32xf32>
    %199 = vector.extract_strided_slice %197 {offsets = [0, 0], sizes = [1, 32], strides = [1, 1]} : vector<2x32xf32> to vector<1x32xf32>
    %200 = tpu.concatenate %198, %199 in 0 : vector<1x32xf32>, vector<1x32xf32> -> vector<2x32xf32>
    %cst_78 = arith.constant 0.000000e+00 : f32
    %201 = vector.broadcast %cst_78 : f32 to vector<2x32xf32>
    %202 = arith.select %177, %201, %200 : vector<2x32xi1>, vector<2x32xf32>
    %203 = vector.extract_strided_slice %197 {offsets = [1, 0], sizes = [1, 32], strides = [1, 1]} : vector<2x32xf32> to vector<1x32xf32>
    %cst_79 = arith.constant 0.000000e+00 : f32
    %204 = vector.broadcast %cst_79 : f32 to vector<1x32xf32>
    %205 = tpu.concatenate %203, %204 in 0 : vector<1x32xf32>, vector<1x32xf32> -> vector<2x32xf32>
    %cst_80 = arith.constant 0.000000e+00 : f32
    %206 = vector.broadcast %cst_80 : f32 to vector<2x32xf32>
    %207 = arith.select %179, %206, %205 : vector<2x32xi1>, vector<2x32xf32>
    %cst_81 = arith.constant 1.000000e+00 : f32
    %208 = vector.broadcast %cst_81 : f32 to vector<2x1xf32>
    %209 = tpu.concatenate %202, %197, %207, %208 in 1 : vector<2x32xf32>, vector<2x32xf32>, vector<2x32xf32>, vector<2x1xf32> -> vector<2x97xf32>
    %210 = arith.truncf %209 : vector<2x97xf32> to vector<2x97xbf16>
    %cst_82 = arith.constant dense<0.000000e+00> : vector<2x32xf32>
    %211 = tpu.matmul %210, %0, %cst_82 {dimension_numbers = #tpu.dot_dimension_numbers<[1], [0], [0], [1], [0, 0, 1, 1], [], []>} : vector<2x97xbf16>, vector<97x32xbf16>, vector<2x32xf32> -> vector<2x32xf32>
    %212 = arith.addf %211, %158 : vector<2x32xf32>
    %cst_83 = arith.constant 1.000000e+00 : f32
    %213 = vector.broadcast %cst_83 : f32 to vector<2x1xf32>
    %214 = tpu.concatenate %212, %213 in 1 : vector<2x32xf32>, vector<2x1xf32> -> vector<2x33xf32>
    %215 = arith.truncf %214 : vector<2x33xf32> to vector<2x33xbf16>
    %c0_84 = arith.constant 0 : index
    %c0_85 = arith.constant 0 : index
    %216 = vector.load %arg4[%c0_84, %c0_85] : memref<33x128xbf16, #tpu.memory_space<vmem>>, vector<33x128xbf16>
    %cst_86 = arith.constant dense<0.000000e+00> : vector<2x128xf32>
    %217 = tpu.matmul %215, %216, %cst_86 {dimension_numbers = #tpu.dot_dimension_numbers<[1], [0], [0], [1], [0, 0, 1, 1], [], []>} : vector<2x33xbf16>, vector<33x128xbf16>, vector<2x128xf32> -> vector<2x128xf32>
    %c0_87 = arith.constant 0 : index
    %c0_88 = arith.constant 0 : index
    %218 = vector.load %arg5[%c0_87, %c0_88] : memref<2x128xf32, #tpu.memory_space<vmem>>, vector<2x128xf32>
    tpu.vector_store %arg5[%c0_87, %c0_88], %217 {strides = array<i32>} : memref<2x128xf32, #tpu.memory_space<vmem>>, vector<2x128xf32>,
    return
  }
  func.func @transform_0(%arg0: i32) -> (i32, i32, i32) {
    %c0_i32 = arith.constant 0 : i32
    %c0_i32_0 = arith.constant 0 : i32
    %c0_i32_1 = arith.constant 0 : i32
    %c0_i32_2 = arith.constant 0 : i32
    return %c0_i32, %c0_i32_0, %c0_i32_1 : i32, i32, i32
  }
  func.func @transform_1(%arg0: i32) -> (i32, i32) {
    %c0_i32 = arith.constant 0 : i32
    %c0_i32_0 = arith.constant 0 : i32
    %c0_i32_1 = arith.constant 0 : i32
    return %c0_i32, %c0_i32_0 : i32, i32
  }
  func.func @transform_2(%arg0: i32) -> (i32, i32) {
    %c0_i32 = arith.constant 0 : i32
    %c0_i32_0 = arith.constant 0 : i32
    %c0_i32_1 = arith.constant 0 : i32
    return %c0_i32, %c0_i32_0 : i32, i32
  }
  func.func @transform_3(%arg0: i32) -> (i32, i32) {
    %c0_i32 = arith.constant 0 : i32
    %c0_i32_0 = arith.constant 0 : i32
    %c0_i32_1 = arith.constant 0 : i32
    return %c0_i32, %c0_i32_0 : i32, i32
  }
  func.func @transform_4(%arg0: i32) -> (i32, i32) {
    %c0_i32 = arith.constant 0 : i32
    %c0_i32_0 = arith.constant 0 : i32
    %c0_i32_1 = arith.constant 0 : i32
    return %c0_i32, %c0_i32_0 : i32, i32
  }
}

</mosaic_0001>

<bundles_post_ra>
// kernel: tpu_custom_call.1
= control target key start
LH: loop header
LB: loop body
LE: loop exit
PB: predicated region body
PF: predicated region fallthrough
CT: control target
= control target key end

     0   :  { %vm124_vm0 = vcmask 1040384   ;;  %v1101_v5 = vmov 0.0   ;;  %s1102_s21 = smov 64   ;;  %v1103_v8 = vmov 0   ;;  %s1104_s23 = smov 32   ;;  %vm1105_vm1 = vmmov 0   ;;  %s1456_s0 = inlined_call_operand.vmem [shape: f32[2,8,32], index: 0, kind: input, shape index: {}]   ;;  %s1457_s1 = inlined_call_operand.vmem [shape: bf16[97,32], index: 1, kind: input, shape index: {}]   ;;  %s1458_s2 = inlined_call_operand.vmem [shape: bf16[97,32], index: 2, kind: input, shape index: {}]   ;;  %s1459_s3 = inlined_call_operand.vmem [shape: bf16[33,128], index: 3, kind: input, shape index: {}]   ;;  %s1460_s4 = inlined_call_operand.hbm [shape: f32[2,128], index: 4, kind: output, shape index: {}]  }
   0x1   :  { %v32_v0 = vld [vmem:[%s1456_s0] sm:$0xff]  ;;  %v805_v1 = vld [vmem:[%s1456_s0 + $0x8] sm:$0xff]  ;;  %891 = vmatprep.subr.bf16.mxu0 %v1101_v5  ;;  %909 = vmatprep.subr.bf16.mxu1 %v1101_v5  ;;  %v1062_v6 = vld [vmem:[%s1457_s1 + $0x30] ss:$0 sps:$4 sm:$0x11]   ;;  %v1145_v9 = vsel %vm124_vm0, 65535, %v1103_v8 }
   0x2   :  { %v34_v2 = vrot.slane %v32_v0, 1  ;;  %v51_v3 = vrot.slane %v805_v1, 1  ;;  %v38_v4 = vrot.slane %v32_v0, 2  ;;  %v1063_v10 = vld [vmem:[%s1458_s2 + $0x30] ss:$0 sps:$4 sm:$0x11]   ;;  %v128_v12 = vand.u32 %v1062_v6, %v1145_v9  ;;  %905 = vmatprep.mubr.msk.bf16.mxu0 %vm1105_vm1, %v1101_v5  ;;  %923 = vmatprep.mubr.msk.bf16.mxu1 %vm1105_vm1, %v1101_v5 }
   0x3   :  { %v55_v11 = vrot.slane %v805_v1, 2  ;;  %v1153_v13 = vand.u32 %v1063_v10, %v1145_v9  ;;  %v1065_v14 = vld [vmem:[%s1457_s1 + $0x28] sm:$0xff]   ;;  %v1066_v15 = vld [vmem:[%s1457_s1 + $0x20] sm:$0xff]   ;;  %v1067_v16 = vld [vmem:[%s1457_s1 + $0x18] sm:$0xff]  }
   0x4   :  { %v1037_v7 = vpack.i.bf16 %v34_v2, %v51_v3  ;;  %39 = vrot.lane.b32.xlu1 %v38_v4, %s1102_s21  ;;  %892 = vmatpush3.bf16.msra.mxu0 %v128_v12 }
   0x5   :  { %893 = vmatprep.subr.bf16.mxu0 %v1101_v5  ;;  %910 = vmatpush3.bf16.msra.mxu1 %v1153_v13 }
   0x6   :  { %1038 = vrot.lane.b32.xlu0 %v1037_v7, %s1104_s23  ;;  %911 = vmatprep.subr.bf16.mxu1 %v1101_v5 }
   0x8   :  { %894 = vmatpush3.bf16.msra.mxu0 %v1065_v14 }
   0x9   :  { %895 = vmatprep.subr.bf16.mxu0 %v1101_v5 }
   0xa   :  { %56 = vrot.lane.b32.xlu0 %v55_v11, %s1102_s21 }
   0xc   :  { %896 = vmatpush3.bf16.msra.mxu0 %v1066_v15 }
   0xd   :  { %897 = vmatprep.subr.bf16.mxu0 %v1101_v5 }
   0xe   :  { %9 = vsyncpa [#allocation4], 0  ;;  %v1068_v17 = vld [vmem:[%s1457_s1 + $0x10] sm:$0xff]   ;;  %v1069_v18 = vld [vmem:[%s1457_s1 + $0x8] sm:$0xff]   ;;  %vm42_vm2 = vcmask 261120   ;;  %vm44_vm3 = vcmask 523264   ;;  %v171_v37 = vlaneseq }
   0xf   :  { %v1070_v19 = vld [vmem:[%s1457_s1] sm:$0xff]   ;;  %vm46_vm4 = vcmask 785408   ;;  %vm65_vm5 = vcmask 1045504   ;;  %vm120_vm6 = vcmask 793600   ;;  %v1202_v34 = vld [vmem:[%s1458_s2 + $0x28] sm:$0xff]   ;;  %v1217_v36 = vld [vmem:[%s1458_s2 + $0x18] sm:$0xff]  }
  0x10   :  { %898 = vmatpush3.bf16.msra.mxu0 %v1067_v16  ;;  %912 = vmatpush3.bf16.msra.mxu1 %v1202_v34  ;;  %v1208_v35 = vld [vmem:[%s1458_s2 + $0x20] sm:$0xff]   ;;  %v1226_v38 = vshrl.u32 %v171_v37, 7  ;;  %v1241_v49 = vld [vmem:[%s1458_s2 + $0x10] sm:$0xff]   ;;  %v1251_v51 = vld [vmem:[%s1458_s2 + $0x8] sm:$0xff]   ;;  %vm224_vm13 = vcmask 1046528  }
  0x11   :  { %899 = vmatprep.subr.bf16.mxu0 %v1101_v5  ;;  %913 = vmatprep.subr.bf16.mxu1 %v1101_v5  ;;  %v1260_v55 = vld [vmem:[%s1458_s2] sm:$0xff]  }
  0x12   :  { %v173_v39 = vadd.s32 8, %v1226_v38  ;;  %v1233_v42 = vmul.u32.u64.low 2863311531, %v1226_v38  ;;  %v1234_v43 = vmul.u32.u64.high 2863311531, %v1226_v38, %v1233_v42 }
  0x14   :  { %900 = vmatpush3.bf16.msra.mxu0 %v1068_v17  ;;  %914 = vmatpush3.bf16.msra.mxu1 %v1208_v35  ;;  %v1229_v40 = vmul.u32.u64.low 2863311531, %v173_v39  ;;  %v1230_v41 = vmul.u32.u64.high 2863311531, %v173_v39, %v1229_v40  ;;  %v180_v45 = vshrl.u32 %v1234_v43, 2 }
  0x15   :  { %901 = vmatprep.subr.bf16.mxu0 %v1101_v5  ;;  %915 = vmatprep.subr.bf16.mxu1 %v1101_v5 }
  0x16   :  { %v191_v44 = vshrl.u32 %v1230_v41, 2  ;;  %v181_v47 = vmul.u32 6, %v180_v45 }
  0x18   :  { %902 = vmatpush3.bf16.msra.mxu0 %v1069_v18  ;;  %916 = vmatpush3.bf16.msra.mxu1 %v1217_v36  ;;  %v192_v46 = vmul.u32 6, %v191_v44  ;;  %v182_v50 = vsub.s32 %v1226_v38, %v181_v47 }
  0x19   :  { %903 = vmatprep.subr.bf16.mxu0 %v1101_v5  ;;  %917 = vmatprep.subr.bf16.mxu1 %v1101_v5 }
  0x1a   :  { %v193_v48 = vsub.s32 %v173_v39, %v192_v46  ;;  %vm196_vm9 = vcmp.ne.s32.totalorder %v182_v50, 0  ;;  %vm198_vm10 = vcmp.lt.s32.totalorder %v182_v50, 0  ;;  %v202_v54 = vadd.s32 6, %v182_v50 }
  0x1b   :  { %vm200_vm12 = vmand %vm198_vm10, %vm196_vm9  ;;  %vm443_vm10 = vcmask 1041408  }
  0x1c   :  { %904 = vmatpush3.bf16.msra.mxu0 %v1070_v19  ;;  %918 = vmatpush3.bf16.msra.mxu1 %v1241_v49  ;;  %vm197_vm7 = vcmp.ne.s32.totalorder %v193_v48, 0  ;;  %vm199_vm8 = vcmp.lt.s32.totalorder %v193_v48, 0  ;;  %v203_v52 = vadd.s32 6, %v193_v48  ;;  %v1268_v60 = vsel %vm200_vm12, %v202_v54, %v182_v50 }
  0x1d   :  { %927 = vmatprep.subr.bf16.mxu0 %v1101_v5  ;;  %919 = vmatprep.subr.bf16.mxu1 %v1101_v5  ;;  %vm201_vm11 = vmand %vm199_vm8, %vm197_vm7  ;;  %vm208_vm14 = vcmp.eq.s32.totalorder %v1268_v60, 5  ;;  %vm230_vm7 = vcmask 1042432   ;;  %vm206_vm8 = vcmp.eq.s32.totalorder %v1268_v60, 0 }
  0x1e   :  { %v1262_v58 = vsel %vm201_vm11, %v203_v52, %v193_v48  ;;  %vm210_vm11 = vcmp.ge.s32.totalorder %v1268_v60, 4 }
  0x1f   :  { %vm209_vm15 = vcmp.eq.s32.totalorder %v1262_v58, 5  ;;  %vm207_vm9 = vcmp.eq.s32.totalorder %v1262_v58, 0  ;;  %vm211_vm12 = vcmp.ge.s32.totalorder %v1262_v58, 4 }
  0x20   :  { %920 = vmatpush3.bf16.msra.mxu1 %v1251_v51 }
  0x21   :  { %921 = vmatprep.subr.bf16.mxu1 %v1101_v5 }
  0x24   :  { %922 = vmatpush3.bf16.msra.mxu1 %v1260_v55 }
  0x25   :  { %945 = vmatprep.subr.bf16.mxu1 %v1101_v5 }
  0x76   :  { %v40_v23 = vpop.permute.xlu1 %39 }
  0x78   :  { %v1039_v20 = vpop.permute.xlu0 %1038 }
  0x79   :  { %v1041_v21 = vunpack.i.h.bf16 %v1039_v20  ;;  %v1040_v22 = vunpack.i.l.bf16 %v1039_v20 }
  0x7b   :  { %v43_v24 = vsel %vm42_vm2, %v32_v0, %v1041_v21  ;;  %v59_v25 = vsel %vm42_vm2, %v805_v1, %v1040_v22 }
  0x7c   :  { %v57_v26 = vpop.permute.xlu0 %56  ;;  %v45_v27 = vsel %vm44_vm3, %v43_v24, %v40_v23 }
  0x7d   :  { %v60_v28 = vsel %vm44_vm3, %v59_v25, %v57_v26  ;;  %v47_v31 = vsel %vm46_vm4, %v45_v27, 1.0 }
  0x7e   :  { %v61_v29 = vsel %vm46_vm4, %v60_v28, 1.0 }
  0x7f   :  { %v63_v30 = vrot.slane %v61_v29, 2 }
  0x81   :  { %v66_v32 = vsel %vm65_vm5, %v47_v31, %v63_v30 }
  0x82   :  { %v67_v33 = vpack.c.bf16 %v63_v30, %v66_v32 }
  0x84   :  { %906 = vmatmul.mubr.msk.bf16.vlgmr.msra.gmra.mxu0 %vm120_vm6, %v67_v33 }
  0x85   :  { %928 = vmatpush3.bf16.msra.mxu0 %v1153_v13  ;;  %941 = vmatprep.mubr.msk.bf16.mxu0 %vm1105_vm1, %v1101_v5 }
  0x86   :  { %929 = vmatprep.subr.bf16.mxu0 %v1101_v5 }
  0x89   :  { %930 = vmatpush3.bf16.msra.mxu0 %v1202_v34 }
  0x8a   :  { %931 = vmatprep.subr.bf16.mxu0 %v1101_v5 }
  0x8d   :  { %932 = vmatpush3.bf16.msra.mxu0 %v1208_v35 }
  0x8e   :  { %933 = vmatprep.subr.bf16.mxu0 %v1101_v5 }
  0x91   :  { %934 = vmatpush3.bf16.msra.mxu0 %v1217_v36 }
  0x92   :  { %935 = vmatprep.subr.bf16.mxu0 %v1101_v5 }
  0x95   :  { %936 = vmatpush3.bf16.msra.mxu0 %v1241_v49 }
  0x96   :  { %937 = vmatprep.subr.bf16.mxu0 %v1101_v5 }
  0x99   :  { %938 = vmatpush3.bf16.msra.mxu0 %v1251_v51 }
  0x9a   :  { %939 = vmatprep.subr.bf16.mxu0 %v1101_v5 }
  0x9d   :  { %940 = vmatpush3.bf16.msra.mxu0 %v1260_v55 }
  0x9e   :  { %963 = vmatprep.subr.bf16.mxu0 %v1101_v5 }
 0x144   :  { %v164_v53 = vpop.f32.mrf.mxu0 }
 0x145   :  { %v212_v56 = vmax.f32 %v164_v53, 0.0 }
 0x146   :  { %v907_v57 = vpop.f32.mrf.mxu0 }
 0x147   :  { %v216_v62 = vrot.slane %v212_v56, 7  ;;  %v225_v0 = vrot.slane %v212_v56, 1 }
 0x148   :  { %v167_v59 = vpop.f32.mrf.mxu0 }
 0x149   :  { %v213_v61 = vmax.f32 %v167_v59, 0.0  ;;  %v221_v14 = vsel %vm124_vm0, 0.0, %v216_v62 }
 0x14a   :  { %v908_v63 = vpop.f32.mrf.mxu0  ;;  %v222_v18 = vsel %vm206_vm8, 0.0, %v221_v14 }
 0x14b   :  { %v217_v1 = vrot.slane %v213_v61, 7  ;;  %v226_v2 = vrot.slane %v213_v61, 1  ;;  %v1042_v3 = vpack.i.bf16 %v213_v61, %v212_v56 }
 0x14d   :  { %1043 = vrot.lane.b32.xlu1 %v1042_v3, %s1104_s23  ;;  %v227_v4 = vsel %vm224_vm13, %v225_v0, %v226_v2  ;;  %v231_v6 = vsel %vm230_vm7, %v226_v2, 0.0  ;;  %v218_v7 = vsel %vm124_vm0, %v216_v62, %v217_v1 }
 0x14e   :  { %v232_v8 = vsel %vm208_vm14, 0.0, %v227_v4  ;;  %v233_v10 = vsel %vm209_vm15, 0.0, %v231_v6  ;;  %v223_v19 = vsel %vm207_vm9, 0.0, %v218_v7 }
 0x14f   :  { %v1047_v11 = vpack.i.bf16 %v233_v10, %v232_v8 }
 0x151   :  { %1048 = vrot.lane.b32.xlu0 %v1047_v11, %s1102_s21 }
 0x1bf   :  { %v1044_v12 = vpop.permute.xlu1 %1043 }
 0x1c0   :  { %v1046_v15 = vunpack.i.h.bf16 %v1044_v12  ;;  %v1045_v16 = vunpack.i.l.bf16 %v1044_v12  ;;  %v459_v12 = vshrl.u32 %v1234_v43, 1 }
 0x1c2   :  { %v248_v22 = vsel %vm42_vm2, %v222_v18, %v1045_v16  ;;  %v249_v23 = vsel %vm42_vm2, %v223_v19, %v1046_v15 }
 0x1c3   :  { %v1049_v17 = vpop.permute.xlu0 %1048 }
 0x1c4   :  { %v1051_v20 = vunpack.i.h.bf16 %v1049_v17  ;;  %v1050_v21 = vunpack.i.l.bf16 %v1049_v17 }
 0x1c6   :  { %v250_v24 = vsel %vm44_vm3, %v248_v22, %v1050_v21  ;;  %v251_v25 = vsel %vm44_vm3, %v249_v23, %v1051_v20  ;;  %v460_v20 = vmul.u32 3, %v459_v12 }
 0x1c7   :  { %v252_v26 = vsel %vm46_vm4, %v250_v24, 1.0  ;;  %v253_v27 = vsel %vm46_vm4, %v251_v25, 1.0 }
 0x1c8   :  { %v254_v28 = vpack.c.bf16 %v253_v27, %v252_v26 }
 0x1ca   :  { %924 = vmatmul.mubr.msk.bf16.vlgmr.msra.gmra.mxu1 %vm120_vm6, %v254_v28 }
 0x1cb   :  { %946 = vmatpush3.bf16.msra.mxu1 %v1153_v13  ;;  %959 = vmatprep.mubr.msk.bf16.mxu1 %vm1105_vm1, %v1101_v5 }
 0x1cc   :  { %947 = vmatprep.subr.bf16.mxu1 %v1101_v5 }
 0x1cf   :  { %948 = vmatpush3.bf16.msra.mxu1 %v1202_v34 }
 0x1d0   :  { %949 = vmatprep.subr.bf16.mxu1 %v1101_v5 }
 0x1d3   :  { %950 = vmatpush3.bf16.msra.mxu1 %v1208_v35 }
 0x1d4   :  { %951 = vmatprep.subr.bf16.mxu1 %v1101_v5 }
 0x1d7   :  { %952 = vmatpush3.bf16.msra.mxu1 %v1217_v36 }
 0x1d8   :  { %953 = vmatprep.subr.bf16.mxu1 %v1101_v5 }
 0x1db   :  { %954 = vmatpush3.bf16.msra.mxu1 %v1241_v49 }
 0x1dc   :  { %955 = vmatprep.subr.bf16.mxu1 %v1101_v5 }
 0x1df   :  { %956 = vmatpush3.bf16.msra.mxu1 %v1251_v51 }
 0x1e0   :  { %957 = vmatprep.subr.bf16.mxu1 %v1101_v5 }
 0x1e3   :  { %958 = vmatpush3.bf16.msra.mxu1 %v1260_v55 }
 0x1e4   :  { %981 = vmatprep.subr.bf16.mxu1 %v1101_v5 }
 0x28a   :  { %v334_v29 = vpop.f32.mrf.mxu1 }
 0x28b   :  { %v341_v30 = vmax.f32 %v334_v29, 0.0 }
 0x28c   :  { %v925_v31 = vpop.f32.mrf.mxu1 }
 0x28d   :  { %v345_v37 = vrot.slane %v341_v30, 7  ;;  %v353_v40 = vrot.slane %v341_v30, 1 }
 0x28e   :  { %v337_v32 = vpop.f32.mrf.mxu1 }
 0x28f   :  { %v342_v33 = vmax.f32 %v337_v32, 0.0  ;;  %v350_v54 = vsel %vm124_vm0, 0.0, %v345_v37 }
 0x290   :  { %v926_v39 = vpop.f32.mrf.mxu1  ;;  %v351_v61 = vsel %vm206_vm8, 0.0, %v350_v54  ;;  %vm450_vm8 = vcmask 257024  }
 0x291   :  { %v346_v41 = vrot.slane %v342_v33, 7  ;;  %v354_v42 = vrot.slane %v342_v33, 1  ;;  %v1052_v44 = vpack.i.bf16 %v342_v33, %v341_v30  ;;  %v461_v30 = vsub.s32 %v1226_v38, %v460_v20 }
 0x293   :  { %1053 = vrot.lane.b32.xlu1 %v1052_v44, %s1104_s23  ;;  %v355_v45 = vsel %vm224_vm13, %v353_v40, %v354_v42  ;;  %v358_v46 = vsel %vm230_vm7, %v354_v42, 0.0  ;;  %v347_v47 = vsel %vm124_vm0, %v345_v37, %v346_v41  ;;  %v467_v33 = vadd.s32 3, %v461_v30 }
 0x294   :  { %v359_v48 = vsel %vm208_vm14, 0.0, %v355_v45  ;;  %v360_v50 = vsel %vm209_vm15, 0.0, %v358_v46  ;;  %v352_v62 = vsel %vm207_vm9, 0.0, %v347_v47 }
 0x295   :  { %v1057_v52 = vpack.i.bf16 %v360_v50, %v359_v48 }
 0x297   :  { %1058 = vrot.lane.b32.xlu0 %v1057_v52, %s1102_s21 }
 0x305   :  { %v1054_v53 = vpop.permute.xlu1 %1053 }
 0x306   :  { %v1056_v56 = vunpack.i.h.bf16 %v1054_v53  ;;  %v1055_v57 = vunpack.i.l.bf16 %v1054_v53 }
 0x308   :  { %v375_v1 = vsel %vm42_vm2, %v351_v61, %v1055_v57  ;;  %v376_v2 = vsel %vm42_vm2, %v352_v62, %v1056_v56 }
 0x309   :  { %v1059_v59 = vpop.permute.xlu0 %1058 }
 0x30a   :  { %v1061_v63 = vunpack.i.h.bf16 %v1059_v59  ;;  %v1060_v0 = vunpack.i.l.bf16 %v1059_v59 }
 0x30c   :  { %v377_v3 = vsel %vm44_vm3, %v375_v1, %v1060_v0  ;;  %v378_v4 = vsel %vm44_vm3, %v376_v2, %v1061_v63 }
 0x30d   :  { %v379_v6 = vsel %vm46_vm4, %v377_v3, 1.0  ;;  %v380_v7 = vsel %vm46_vm4, %v378_v4, 1.0 }
 0x30e   :  { %v381_v8 = vpack.c.bf16 %v380_v7, %v379_v6 }
 0x310   :  { %942 = vmatmul.mubr.msk.bf16.vlgmr.msra.gmra.mxu0 %vm120_vm6, %v381_v8 }
 0x311   :  { %964 = vmatpush3.bf16.msra.mxu0 %v1153_v13  ;;  %977 = vmatprep.mubr.msk.bf16.mxu0 %vm1105_vm1, %v1101_v5 }
 0x312   :  { %965 = vmatprep.subr.bf16.mxu0 %v1101_v5 }
 0x315   :  { %966 = vmatpush3.bf16.msra.mxu0 %v1202_v34 }
 0x316   :  { %967 = vmatprep.subr.bf16.mxu0 %v1101_v5 }
 0x319   :  { %968 = vmatpush3.bf16.msra.mxu0 %v1208_v35 }
 0x31a   :  { %969 = vmatprep.subr.bf16.mxu0 %v1101_v5 }
 0x31d   :  { %970 = vmatpush3.bf16.msra.mxu0 %v1217_v36 }
 0x31e   :  { %971 = vmatprep.subr.bf16.mxu0 %v1101_v5 }
 0x321   :  { %972 = vmatpush3.bf16.msra.mxu0 %v1241_v49 }
 0x322   :  { %973 = vmatprep.subr.bf16.mxu0 %v1101_v5 }
 0x325   :  { %974 = vmatpush3.bf16.msra.mxu0 %v1251_v51 }
 0x326   :  { %975 = vmatprep.subr.bf16.mxu0 %v1101_v5 }
 0x329   :  { %976 = vmatpush3.bf16.msra.mxu0 %v1260_v55 }
 0x32a   :  { %999 = vmatprep.subr.bf16.mxu0 %v1101_v5 }
 0x3d0   :  { %v419_v10 = vpop.f32.mrf.mxu0 }
 0x3d1   :  { %v428_v15 = vrot.slane %v419_v10, 1  ;;  %v438_v16 = vrot.slane %v419_v10, 2 }
 0x3d2   :  { %v943_v11 = vpop.f32.mrf.mxu0 }
 0x3d4   :  { %v422_v14 = vpop.f32.mrf.mxu0 }
 0x3d5   :  { %v429_v17 = vrot.slane %v422_v14, 1  ;;  %v439_v18 = vrot.slane %v422_v14, 2 }
 0x3d6   :  { %v944_v19 = vpop.f32.mrf.mxu0 }
 0x3d7   :  { %v430_v21 = vsel %vm224_vm13, %v428_v15, %v429_v17  ;;  %v433_v22 = vsel %vm230_vm7, %v429_v17, 0.0  ;;  %v440_v23 = vsel %vm65_vm5, %v438_v16, %v439_v18  ;;  %v444_v24 = vsel %vm443_vm10, %v439_v18, 0.0 }
 0x3d8   :  { %v434_v43 = vsel %vm208_vm14, 0.0, %v430_v21  ;;  %v435_v25 = vsel %vm209_vm15, 0.0, %v433_v22  ;;  %v445_v28 = vsel %vm210_vm11, 0.0, %v440_v23  ;;  %v446_v29 = vsel %vm211_vm12, 0.0, %v444_v24 }
 0x3d9   :  { %v436_v26 = vmax.f32 %v419_v10, %v434_v43  ;;  %v437_v27 = vmax.f32 %v422_v14, %v435_v25  ;;  %vm464_vm5 = vcmp.ne.s32.totalorder %v461_v30, 0  ;;  %vm465_vm13 = vcmp.lt.s32.totalorder %v461_v30, 0  ;;  %v1064_v21 = vld [vmem:[%s1459_s3 + $0x10] ss:$0 sps:$4 sm:$0x11]  }
 0x3da   :  { %vm466_vm7 = vmand %vm465_vm13, %vm464_vm5  ;;  %vm480_vm14 = vcmask 1044480   ;;  %vm609_vm10 = vcmask 1043456   ;;  %v748_v43 = vand.u32 %v1064_v21, %v1145_v9 }
 0x3db   :  { %v447_v31 = vmax.f32 %v436_v26, %v445_v28  ;;  %v448_v32 = vmax.f32 %v437_v27, %v446_v29  ;;  %v1362_v58 = vsel %vm466_vm7, %v467_v33, %v461_v30  ;;  %v1077_v27 = vld [vmem:[%s1459_s3 + $0x8] sm:$0xff]  }
 0x3dc   :  { %vm470_vm15 = vcmp.eq.s32.totalorder %v1362_v58, 2  ;;  %vm469_vm9 = vcmp.eq.s32.totalorder %v1362_v58, 0  ;;  %vm471_vm11 = vcmp.ge.s32.totalorder %v1362_v58, 1 }
 0x3dd   :  { %449 = vst.msk [vmem:[#allocation2] sm:$0xff] %vm42_vm2, %v447_v31 }
 0x3de   :  { %451 = vst.msk [vmem:[#allocation2 + $0x8] sm:$0xf] %vm450_vm8, %v448_v32 }
 0x3e5   :  { %v1360_v60 = vld [vmem:[#allocation2] ss:$2 sm:$0x3f] }
 0x3e6   :  { %v472_v37 = vmax.f32 %v1360_v60, 0.0 }
 0x3e8   :  { %483 = vrot.lane.b32.xlu1 %v472_v37, %s1104_s23  ;;  %v478_v38 = vrot.slane %v472_v37, 1  ;;  %v474_v41 = vrot.slane %v472_v37, 7 }
 0x3ea   :  { %v481_v39 = vsel %vm480_vm14, %v478_v38, 0.0  ;;  %v476_v42 = vsel %vm124_vm0, 0.0, %v474_v41 }
 0x3eb   :  { %v482_v40 = vsel %vm470_vm15, 0.0, %v481_v39  ;;  %v477_v45 = vsel %vm469_vm9, 0.0, %v476_v42 }
 0x3ec   :  { %487 = vrot.lane.b32.xlu0 %v482_v40, %s1102_s21 }
 0x45a   :  { %v484_v44 = vpop.permute.xlu1 %483 }
 0x45b   :  { %v490_v46 = vsel %vm42_vm2, %v477_v45, %v484_v44 }
 0x45e   :  { %v488_v47 = vpop.permute.xlu0 %487 }
 0x45f   :  { %v491_v48 = vsel %vm44_vm3, %v490_v46, %v488_v47 }
 0x460   :  { %v492_v50 = vsel %vm46_vm4, %v491_v48, 1.0 }
 0x461   :  { %v493_v52 = vpack.c.bf16 %v492_v50, %v492_v50 }
 0x463   :  { %960 = vmatmul.mubr.msk.bf16.vlgmr.msra.gmra.mxu1 %vm120_vm6, %v493_v52 }
 0x464   :  { %982 = vmatpush3.bf16.msra.mxu1 %v1153_v13  ;;  %995 = vmatprep.mubr.msk.bf16.mxu1 %vm1105_vm1, %v1101_v5 }
 0x465   :  { %983 = vmatprep.subr.bf16.mxu1 %v1101_v5 }
 0x468   :  { %984 = vmatpush3.bf16.msra.mxu1 %v1202_v34 }
 0x469   :  { %985 = vmatprep.subr.bf16.mxu1 %v1101_v5 }
 0x46c   :  { %986 = vmatpush3.bf16.msra.mxu1 %v1208_v35 }
 0x46d   :  { %987 = vmatprep.subr.bf16.mxu1 %v1101_v5 }
 0x470   :  { %988 = vmatpush3.bf16.msra.mxu1 %v1217_v36 }
 0x471   :  { %989 = vmatprep.subr.bf16.mxu1 %v1101_v5 }
 0x474   :  { %990 = vmatpush3.bf16.msra.mxu1 %v1241_v49 }
 0x475   :  { %991 = vmatprep.subr.bf16.mxu1 %v1101_v5 }
 0x478   :  { %992 = vmatpush3.bf16.msra.mxu1 %v1251_v51 }
 0x479   :  { %993 = vmatprep.subr.bf16.mxu1 %v1101_v5 }
 0x47c   :  { %994 = vmatpush3.bf16.msra.mxu1 %v1260_v55 }
 0x47d   :  { %1017 = vmatprep.subr.bf16.mxu1 %v1101_v5 }
 0x523   :  { %v531_v53 = vpop.f32.mrf.mxu1 }
 0x524   :  { %v537_v54 = vmax.f32 %v531_v53, 0.0 }
 0x525   :  { %v961_v56 = vpop.f32.mrf.mxu1 }
 0x526   :  { %547 = vrot.lane.b32.xlu1 %v537_v54, %s1104_s23  ;;  %v543_v57 = vrot.slane %v537_v54, 1  ;;  %v539_v0 = vrot.slane %v537_v54, 7 }
 0x527   :  { %v534_v59 = vpop.f32.mrf.mxu1 }
 0x528   :  { %v545_v61 = vsel %vm480_vm14, %v543_v57, 0.0  ;;  %v541_v1 = vsel %vm124_vm0, 0.0, %v539_v0 }
 0x529   :  { %v962_v62 = vpop.f32.mrf.mxu1  ;;  %v546_v63 = vsel %vm470_vm15, 0.0, %v545_v61  ;;  %v542_v3 = vsel %vm469_vm9, 0.0, %v541_v1 }
 0x52a   :  { %551 = vrot.lane.b32.xlu0 %v546_v63, %s1102_s21 }
 0x598   :  { %v548_v2 = vpop.permute.xlu1 %547 }
 0x599   :  { %v554_v4 = vsel %vm42_vm2, %v542_v3, %v548_v2 }
 0x59c   :  { %v552_v6 = vpop.permute.xlu0 %551 }
 0x59d   :  { %v555_v7 = vsel %vm44_vm3, %v554_v4, %v552_v6 }
 0x59e   :  { %v556_v8 = vsel %vm46_vm4, %v555_v7, 1.0 }
 0x59f   :  { %v557_v10 = vpack.c.bf16 %v556_v8, %v556_v8 }
 0x5a1   :  { %978 = vmatmul.mubr.msk.bf16.vlgmr.msra.gmra.mxu0 %vm120_vm6, %v557_v10 }
 0x5a2   :  { %1000 = vmatpush3.bf16.msra.mxu0 %v1153_v13  ;;  %1013 = vmatprep.mubr.msk.bf16.mxu0 %vm1105_vm1, %v1101_v5 }
 0x5a3   :  { %1001 = vmatprep.subr.bf16.mxu0 %v1101_v5 }
 0x5a6   :  { %1002 = vmatpush3.bf16.msra.mxu0 %v1202_v34 }
 0x5a7   :  { %1003 = vmatprep.subr.bf16.mxu0 %v1101_v5 }
 0x5aa   :  { %1004 = vmatpush3.bf16.msra.mxu0 %v1208_v35 }
 0x5ab   :  { %1005 = vmatprep.subr.bf16.mxu0 %v1101_v5 }
 0x5ae   :  { %1006 = vmatpush3.bf16.msra.mxu0 %v1217_v36 }
 0x5af   :  { %1007 = vmatprep.subr.bf16.mxu0 %v1101_v5 }
 0x5b2   :  { %1008 = vmatpush3.bf16.msra.mxu0 %v1241_v49 }
 0x5b3   :  { %1009 = vmatprep.subr.bf16.mxu0 %v1101_v5 }
 0x5b6   :  { %1010 = vmatpush3.bf16.msra.mxu0 %v1251_v51 }
 0x5b7   :  { %1011 = vmatprep.subr.bf16.mxu0 %v1101_v5 }
 0x5ba   :  { %1012 = vmatpush3.bf16.msra.mxu0 %v1260_v55 }
 0x661   :  { %v595_v13 = vpop.f32.mrf.mxu0 }
 0x662   :  { %v596_v34 = vadd.f32 %v595_v13, %v1360_v60 }
 0x663   :  { %v979_v35 = vpop.f32.mrf.mxu0 }
 0x664   :  { %v602_v11 = vrot.slane %v596_v34, 1  ;;  %v607_v12 = vrot.slane %v596_v34, 2 }
 0x665   :  { %v598_v36 = vpop.f32.mrf.mxu0 }
 0x666   :  { %v604_v49 = vsel %vm480_vm14, %v602_v11, 0.0  ;;  %v610_v14 = vsel %vm609_vm10, %v607_v12, 0.0 }
 0x667   :  { %v605_v51 = vsel %vm470_vm15, 0.0, %v604_v49  ;;  %v980_v15 = vpop.f32.mrf.mxu0  ;;  %v611_v17 = vsel %vm471_vm11, 0.0, %v610_v14 }
 0x668   :  { %v606_v16 = vmax.f32 %v596_v34, %v605_v51 }
 0x66a   :  { %v612_v55 = vmax.f32 %v606_v16, %v611_v17 }
 0x66c   :  { %v614_v18 = vrot.slane %v612_v55, 2 }
 0x66e   :  { %v616_v19 = vsel %vm124_vm0, %v612_v55, %v614_v18  ;;  %vm743_vm0 = vcmask 269312  }
 0x66f   :  { %v617_v20 = vmax.f32 %v616_v19, 0.0 }
 0x671   :  { %619 = vrot.lane.b32.xlu1 %v617_v20, %s1104_s23 }
 0x6e3   :  { %v620_v22 = vpop.permute.xlu1 %619 }
 0x6e4   :  { %v622_v23 = vsel %vm42_vm2, 0.0, %v620_v22 }
 0x6e5   :  { %v623_v24 = vsel %vm44_vm3, %v622_v23, 0.0 }
 0x6e6   :  { %v624_v25 = vsel %vm46_vm4, %v623_v24, 1.0 }
 0x6e7   :  { %v625_v26 = vpack.c.bf16 %v624_v25, %v624_v25 }
 0x6e9   :  { %996 = vmatmul.mubr.msk.bf16.vlgmr.msra.gmra.mxu1 %vm120_vm6, %v625_v26 }
 0x6ea   :  { %1018 = vmatpush3.bf16.msra.mxu1 %v748_v43  ;;  %1023 = vmatprep.mubr.msk.bf16.mxu1 %vm1105_vm1, %v1101_v5 }
 0x6eb   :  { %1019 = vmatprep.subr.bf16.mxu1 %v1101_v5 }
 0x6ee   :  { %1020 = vmatpush3.bf16.msra.mxu1 %v1077_v27 }
 0x6ef   :  { %1021 = vmatprep.subr.bf16.mxu1 %v1101_v5  ;;  %v1078_v5 = vld [vmem:[%s1459_s3] sm:$0xff]  }
 0x6f2   :  { %1022 = vmatpush3.bf16.msra.mxu1 %v1078_v5 }
 0x7a9   :  { %v663_v28 = vpop.f32.mrf.mxu1 }
 0x7aa   :  { %v669_v9 = vmax.f32 %v663_v28, 0.0 }
 0x7ab   :  { %v997_v29 = vpop.f32.mrf.mxu1 }
 0x7ac   :  { %671 = vrot.lane.b32.xlu0 %v669_v9, %s1104_s23  ;;  %s1106_s23 = smov [#allocation3]  }
 0x7ad   :  { %v666_v30 = vpop.f32.mrf.mxu1  ;;  %s797_s26 = sshll.u32 %s1106_s23, 4  ;;  %s798_s26 = int_to_ptr.vmem [resolvable:$true] %s797_s26 }
 0x7ae   :  { %s1079_s27 = scalar_lea.vmem %s798_s26, 32  ;;  %p1084_p1 = scmp.lt.s32.totalorder %s798_s26, %s798_s26 }
 0x7af   :  { %v998_v31 = vpop.f32.mrf.mxu1  ;;  %p1080_p0 = scmp.ne.s32.totalorder %s798_s26, %s1079_s27  ;;  %p1085_p2 = scmp.lt.s32.totalorder %s1079_s27, %s1079_s27 }
 0x7b1   :  { %p1086_p3 = por %p1085_p2, %p1084_p1 }
 0x7b3   :  { %p1087_p4 = pnand %p1086_p3, %p1080_p0 }
 0x81e   :  { %v672_v32 = vpop.permute.xlu0 %671 }
 0x81f   :  { %v674_v33 = vsel %vm42_vm2, 0.0, %v672_v32 }
 0x820   :  { %v675_v60 = vsel %vm44_vm3, %v674_v33, 0.0 }
 0x821   :  { %v676_v58 = vsel %vm46_vm4, %v675_v60, 1.0 }
 0x822   :  { %v677_v37 = vpack.c.bf16 %v676_v58, %v676_v58 }
 0x824   :  { %1014 = vmatmul.mubr.msk.bf16.vlgmr.msra.gmra.mxu0 %vm120_vm6, %v677_v37 }
 0x8e4   :  { %v715_v38 = vpop.f32.mrf.mxu0 }
 0x8e5   :  { %v716_v39 = vadd.f32 %v715_v38, %v616_v19 }
 0x8e6   :  { %v1015_v40 = vpop.f32.mrf.mxu0 }
 0x8e7   :  { %v721_v41 = vsel %vm42_vm2, %v716_v39, 1.0 }
 0x8e8   :  { %v722_v42 = vpack.c.bf16 %v721_v41, %v721_v41  ;;  %v718_v44 = vpop.f32.mrf.mxu0 }
 0x8ea   :  { %v1016_v45 = vpop.f32.mrf.mxu0  ;;  %1024 = vmatmul.mubr.msk.bf16.vlgmr.msra.gmra.mxu1 %vm743_vm0, %v722_v42 }
 0x9aa   :  { %v784_v46 = vpop.f32.mrf.mxu1 }
 0x9ab   :  { %790 = vst [vmem:[#allocation3] sm:$0x3] %v784_v46 }
 0x9ac   :  { %v1025_v47 = vpop.f32.mrf.mxu1 }
 0x9ad   :  { %1090 = shalt.err (!%p1087_p4)
}
 0x9ae   :  { %800 = dma.vmem_to_hbm [thread:$0]  %s798_s26, 32, %s1460_s4, [#allocation4]   ;;  %v787_v48 = vpop.f32.mrf.mxu1 }
 0x9b0   :  { %v1026_v50 = vpop.f32.mrf.mxu1 }
 0x9b1   :  { %1099 = dma.done.wait [#allocation4], 32  }
 0x9b2   :  { %1100 = vsyncadd [#allocation4], 4294967264 }
 0x9b3   :  { %804 = vsyncpa [#allocation4], 1 }

</bundles_post_ra>
